<compile_context>
chip_gen: v5e
topology: v5e:2x2
jax: 0.10.0
libtpu: 0.0.40
codegen_flags: <defaults>
</compile_context>

<pallas_src>
import math

import jax
import jax.numpy as jnp
from jax.experimental import pallas as pl
from jax.experimental.pallas import tpu as pltpu

NEG_SLOPE = 0.01  # nn.LeakyReLU() default negative_slope


def _leaky_relu(x):
    return jnp.where(x >= 0, x, NEG_SLOPE * x)


def _round_up(x, m):
    return ((x + m - 1) // m) * m


def _cdiv(a, b):
    return -(-a // b)


def _choose_tm(N, tm, *, min_steps=4, tm_min=512, tm_max=2048):
    """N-adaptive batch tile: large enough to amortize per-grid-step overhead,
    small enough to keep >= min_steps grid steps (v7x megacore + pipelining)."""
    if tm is None:
        tm = max(min(_cdiv(N, min_steps), tm_max), tm_min)
    tm = min(tm, _round_up(N, 8))      # never bigger than the (8-padded) batch
    return max(_round_up(tm, 8), 8)


def _make_vae_kernel(input_dim, latent_dim, h0, h1):
    """Kernel closure over the static feature sizes."""
    two_lat = 2 * latent_dim

    def kernel(xe_ref, w1_ref, w2_ref, w3_ref, wd1_ref, wd2_ref, wd3_ref,
               b_ref, out_ref):
        cdt = w1_ref.dtype          # MXU operand dtype (bf16 or f32)
        f32 = jnp.float32

        # biases live in one resident (8, >=128) slab, one bias per sublane row
        b1, b2, b3 = b_ref[0:1, :h0], b_ref[1:2, :h1], b_ref[2:3, :two_lat]
        bd1, bd2, bd3 = b_ref[3:4, :h1], b_ref[4:5, :h0], b_ref[5:6, :input_dim]

        xe = xe_ref[...]                              # (tm, input_dim + latent)
        eps = xe[:, input_dim:].astype(f32)           # (tm, latent)

        # ---- encoder (w1 is zero-extended over the eps columns) ----
        h = jnp.dot(xe.astype(cdt), w1_ref[...], preferred_element_type=f32) + b1
        h = _leaky_relu(h)
        h = jnp.dot(h.astype(cdt), w2_ref[...], preferred_element_type=f32) + b2
        h = _leaky_relu(h)
        # fused (mu | log_var) head: f32 operands (tiny matmul, tighter stats)
        h3 = jnp.dot(h, w3_ref[...], preferred_element_type=f32) + b3
        mu = h3[:, :latent_dim]
        lv = h3[:, latent_dim:]

        # ---- reparameterize: z = mu + eps * exp(0.5 * log_var) ----
        z = mu + eps * jnp.exp(0.5 * lv)

        # ---- decoder ----
        d = jnp.dot(z.astype(cdt), wd1_ref[...], preferred_element_type=f32) + bd1
        d = _leaky_relu(d)
        d = jnp.dot(d.astype(cdt), wd2_ref[...], preferred_element_type=f32) + bd2
        d = _leaky_relu(d)
        xr = jnp.tanh(jnp.dot(d.astype(cdt), wd3_ref[...],
                              preferred_element_type=f32) + bd3)

        # single lane-dense output slab: [ x_reconstructed | mu | log_var ]
        out_ref[:, :input_dim] = xr
        out_ref[:, input_dim:] = h3    # mu|log_var contiguous -> ONE store

    return kernel


def _prep_operands(params, input_dim, latent_dim, compute_dtype):
    (w1, b1, w2, b2, w3, b3, wd1, bd1, wd2, bd2, wd3, bd3) = params
    h0, h1 = w1.shape[1], w2.shape[1]

    # zero-extend w1 over the eps columns of the fused [x | eps] input slab
    w1e = jnp.concatenate([w1, jnp.zeros((latent_dim, h0), w1.dtype)], axis=0)

    # MXU operands in compute dtype; the tiny (mu|log_var) head stays f32
    w1e, w2c, wd1c, wd2c, wd3c = (
        w.astype(compute_dtype) for w in (w1e, w2, wd1, wd2, wd3))
    w3c = w3.astype(jnp.float32)

    # pack the six biases into one resident (8, >=128) f32 slab (row k = bias k)
    biases = (b1, b2, b3, bd1, bd2, bd3)
    bias_cols = _round_up(max(b.shape[-1] for b in biases), 128)
    rows = [jnp.pad(b.reshape(-1).astype(jnp.float32),
                    (0, bias_cols - b.shape[-1])) for b in biases]
    rows += [jnp.zeros((bias_cols,), jnp.float32)] * (8 - len(rows))
    b_slab = jnp.stack(rows)

    weight_args = (w1e, w2c, w3c, wd1c, wd2c, wd3c, b_slab)
    return weight_args, h0, h1


def _vmem_limit_bytes(tm, in_cols, out_cols, in_itemsize, weight_args, max_feat):
    """Right-sized VMEM limit derived from the actual tile set (with headroom)."""
    weight_bytes = sum(math.prod(a.shape) * jnp.dtype(a.dtype).itemsize
                       for a in weight_args)
    pipelined = 2 * tm * (in_cols * in_itemsize + out_cols * 4)  # dbl-buffered
    live = 8 * tm * max_feat * 4          # generous bound on live intermediates
    est = pipelined + 2 * weight_bytes + live
    return int(min(max(2 * est, 16 << 20), 64 << 20))


def vae_precoder_forward_slab(x_flat, eps, params, *,
                              compute_dtype=jnp.bfloat16, tm=None):
    """Fused VAE forward.  Returns ONE (N, input_dim + 2*latent) f32 slab
    laid out as [ x_reconstructed | mu | log_var ].  Consume it directly (or
    under jit) to avoid extra HBM slice passes."""
    N, input_dim = x_flat.shape
    latent_dim = eps.shape[1]
    in_cols = input_dim + latent_dim
    out_cols = input_dim + 2 * latent_dim

    weight_args, h0, h1 = _prep_operands(params, input_dim, latent_dim,
                                         compute_dtype)

    # one lane-dense input slab [x | eps]; eps upcast in-kernel for reparam
    xe = jnp.concatenate([x_flat.astype(compute_dtype),
                          eps.astype(compute_dtype)], axis=1)

    tm = _choose_tm(N, tm)
    grid = (_cdiv(N, tm),)        # ragged last block; no host-side padding

    def batch_spec(cols):
        return pl.BlockSpec((tm, cols), lambda i: (i, 0))

    def resident_spec(arr):
        # constant index map: the tiny weight/bias tile is DMA'd once and
        # stays VMEM-resident across all batch grid steps.
        return pl.BlockSpec(arr.shape, lambda i: (0, 0))

    max_feat = max(h0, h1, 2 * latent_dim, in_cols, out_cols)
    vmem_limit = _vmem_limit_bytes(tm, in_cols, out_cols,
                                   jnp.dtype(compute_dtype).itemsize,
                                   weight_args, max_feat)

    out = pl.pallas_call(
        _make_vae_kernel(input_dim, latent_dim, h0, h1),
        out_shape=jax.ShapeDtypeStruct((N, out_cols), jnp.float32),
        grid_spec=pl.GridSpec(
            grid=grid,
            in_specs=[batch_spec(in_cols)]
                     + [resident_spec(a) for a in weight_args],
            out_specs=batch_spec(out_cols),
        ),
        compiler_params=pltpu.CompilerParams(
            dimension_semantics=("parallel",),   # megacore-shard the batch grid
            vmem_limit_bytes=vmem_limit,
        ),
    )(xe, *weight_args)
    return out


def vae_precoder_forward(x_flat, eps, params, *,
                         compute_dtype=jnp.bfloat16, tm=None):
    """3-tensor API matching the PyTorch module: (x_reconstructed, mu, log_var).
    jit this wrapper so the output slices fuse with the kernel's consumer."""
    out = vae_precoder_forward_slab(x_flat, eps, params,
                                    compute_dtype=compute_dtype, tm=tm)
    input_dim = x_flat.shape[-1]
    latent_dim = eps.shape[-1]
    return (out[:, :input_dim],
            out[:, input_dim:input_dim + latent_dim],
            out[:, input_dim + latent_dim:])


def init_params(key, input_dim, hidden_dim, latent_dim):
    """Deterministic synthetic parameters; Linear stored as (in, out).

    The encoder's last layer is stored FUSED as (hidden[1], 2*latent) so the
    kernel does a single matmul for (mu | log_var)."""
    dims = [
        (input_dim, hidden_dim[0]),         # enc L1
        (hidden_dim[0], hidden_dim[1]),     # enc L2
        (hidden_dim[1], 2 * latent_dim),    # enc L3 (mu | log_var fused)
        (latent_dim, hidden_dim[1]),        # dec L1
        (hidden_dim[1], hidden_dim[0]),     # dec L2
        (hidden_dim[0], input_dim),         # dec L3
    ]
    params = []
    for fan_in, fan_out in dims:
        key, kw, kb = jax.random.split(key, 3)
        scale = 1.0 / jnp.sqrt(jnp.float32(fan_in))
        w = jax.random.uniform(kw, (fan_in, fan_out), jnp.float32, -scale, scale)
        b = jax.random.uniform(kb, (1, fan_out), jnp.float32, -scale, scale)
        params.extend([w, b])
    return tuple(params)


def vae_reference(x_flat, eps, params):
    """Pure-JAX f32 reference (matches the PyTorch forward)."""
    (w1, b1, w2, b2, w3, b3, wd1, bd1, wd2, bd2, wd3, bd3) = params
    latent_dim = eps.shape[1]

    def lrelu(v):
        return jnp.where(v >= 0, v, NEG_SLOPE * v)

    h = lrelu(x_flat @ w1 + b1)
    h = lrelu(h @ w2 + b2)
    h3 = h @ w3 + b3
    mu, lv = h3[:, :latent_dim], h3[:, latent_dim:]
    z = mu + eps * jnp.exp(0.5 * lv)
    d = lrelu(z @ wd1 + bd1)
    d = lrelu(d @ wd2 + bd2)
    xr = jnp.tanh(d @ wd3 + bd3)
    return xr, mu, lv


if __name__ == "__main__":
    input_dim_precoder = 32
    hidden_dim = [64, 32]
    latent_dim = 16

    key = jax.random.PRNGKey(0)
    key, kx, keps, kp, kx2, keps2 = jax.random.split(key, 6)

    params = init_params(kp, input_dim_precoder, hidden_dim, latent_dim)

    # ---- small case (x.view(-1, input_dim) flattening of a (2,4,32) input) ----
    x = jax.random.normal(kx, (2, 4, input_dim_precoder), jnp.float32)
    x_flat = x.reshape(-1, input_dim_precoder)                      # (8, 32)
    N = x_flat.shape[0]
    # TODO(synk): torch.randn_like draws eps inside the module; here eps is
    # drawn host-side with jax.random and passed in so the reference check is
    # deterministic (pltpu.prng_* could generate it in-kernel instead).
    eps = jax.random.normal(keps, (N, latent_dim), jnp.float32)

    xr_ref, mu_ref, lv_ref = vae_reference(x_flat, eps, params)

    # f32 compute path: tight check against the pure-JAX reference.
    x_rec, mu, lv = jax.block_until_ready(
        vae_precoder_forward(x_flat, eps, params, compute_dtype=jnp.float32))
    assert x_rec.shape == (N, input_dim_precoder)
    assert mu.shape == (N, latent_dim) and lv.shape == (N, latent_dim)
    assert jnp.allclose(x_rec, xr_ref, atol=1e-4)
    assert jnp.allclose(mu, mu_ref, atol=1e-4)
    assert jnp.allclose(lv, lv_ref, atol=1e-4)

    # bf16 MXU-operand path (f32 accumulation, f32 head): loose check.
    x_rec16, mu16, lv16 = jax.block_until_ready(
        vae_precoder_forward(x_flat, eps, params, compute_dtype=jnp.bfloat16))
    assert jnp.allclose(x_rec16, xr_ref, atol=1e-1)
    assert jnp.allclose(mu16, mu_ref, atol=1e-1)
    assert jnp.allclose(lv16, lv_ref, atol=1e-1)

    # ---- larger batch: exercises the adaptive tile + ragged last block path ----
    N2 = 2048 + 40   # not a multiple of tm -> ragged (clipped) last block
    x2 = jax.random.normal(kx2, (N2, input_dim_precoder), jnp.float32)
    eps2 = jax.random.normal(keps2, (N2, latent_dim), jnp.float32)

    fwd_jit = jax.jit(vae_precoder_forward,
                      static_argnames=("compute_dtype", "tm"))
    xr2, mu2, lv2 = jax.block_until_ready(
        fwd_jit(x2, eps2, params, compute_dtype=jnp.bfloat16))
    xr2_ref, mu2_ref, lv2_ref = vae_reference(x2, eps2, params)
    assert xr2.shape == (N2, input_dim_precoder)
    assert jnp.allclose(xr2, xr2_ref, atol=1e-1)
    assert jnp.allclose(mu2, mu2_ref, atol=1e-1)
    assert jnp.allclose(lv2, lv2_ref, atol=1e-1)

    print("KERNEL_OK")
</pallas_src>

<mosaic_0001>
module attributes {stable_mosaic.version = 11 : i64} {
  func.func @kernel(%arg0: i32, %arg1: memref<8x48xf32, #tpu.memory_space<vmem>>, %arg2: memref<48x64xf32, #tpu.memory_space<vmem>>, %arg3: memref<64x32xf32, #tpu.memory_space<vmem>>, %arg4: memref<32x32xf32, #tpu.memory_space<vmem>>, %arg5: memref<16x32xf32, #tpu.memory_space<vmem>>, %arg6: memref<32x64xf32, #tpu.memory_space<vmem>>, %arg7: memref<64x32xf32, #tpu.memory_space<vmem>>, %arg8: memref<8x128xf32, #tpu.memory_space<vmem>>, %arg9: memref<8x64xf32, #tpu.memory_space<vmem>>) attributes {dimension_semantics = [#tpu.dimension_semantics<parallel>], iteration_bounds = array<i64: 1>, scalar_prefetch = 0 : i64, scratch_operands = 0 : i64, tpu.core_type = #tpu.core_type<tc>, window_params = [{transform_indices = @transform_0, window_bounds = array<i64: 8, 48>}, {pipeline_mode = #tpu.pipeline_mode<synchronous>, transform_indices = @transform_1, window_bounds = array<i64: 48, 64>}, {pipeline_mode = #tpu.pipeline_mode<synchronous>, transform_indices = @transform_2, window_bounds = array<i64: 64, 32>}, {pipeline_mode = #tpu.pipeline_mode<synchronous>, transform_indices = @transform_3, window_bounds = array<i64: 32, 32>}, {pipeline_mode = #tpu.pipeline_mode<synchronous>, transform_indices = @transform_4, window_bounds = array<i64: 16, 32>}, {pipeline_mode = #tpu.pipeline_mode<synchronous>, transform_indices = @transform_5, window_bounds = array<i64: 32, 64>}, {pipeline_mode = #tpu.pipeline_mode<synchronous>, transform_indices = @transform_6, window_bounds = array<i64: 64, 32>}, {pipeline_mode = #tpu.pipeline_mode<synchronous>, transform_indices = @transform_7, window_bounds = array<i64: 8, 128>}, {transform_indices = @transform_8, window_bounds = array<i64: 8, 64>}]} {
    %c0 = arith.constant 0 : index
    %c0_0 = arith.constant 0 : index
    %0 = vector.load %arg8[%c0, %c0_0] : memref<8x128xf32, #tpu.memory_space<vmem>>, vector<1x64xf32>
    %c1 = arith.constant 1 : index
    %c0_1 = arith.constant 0 : index
    %1 = vector.load %arg8[%c1, %c0_1] : memref<8x128xf32, #tpu.memory_space<vmem>>, vector<1x32xf32>
    %c2 = arith.constant 2 : index
    %c0_2 = arith.constant 0 : index
    %2 = vector.load %arg8[%c2, %c0_2] : memref<8x128xf32, #tpu.memory_space<vmem>>, vector<1x32xf32>
    %c3 = arith.constant 3 : index
    %c0_3 = arith.constant 0 : index
    %3 = vector.load %arg8[%c3, %c0_3] : memref<8x128xf32, #tpu.memory_space<vmem>>, vector<1x32xf32>
    %c4 = arith.constant 4 : index
    %c0_4 = arith.constant 0 : index
    %4 = vector.load %arg8[%c4, %c0_4] : memref<8x128xf32, #tpu.memory_space<vmem>>, vector<1x64xf32>
    %c5 = arith.constant 5 : index
    %c0_5 = arith.constant 0 : index
    %5 = vector.load %arg8[%c5, %c0_5] : memref<8x128xf32, #tpu.memory_space<vmem>>, vector<1x32xf32>
    %c0_6 = arith.constant 0 : index
    %c0_7 = arith.constant 0 : index
    %6 = vector.load %arg1[%c0_6, %c0_7] : memref<8x48xf32, #tpu.memory_space<vmem>>, vector<8x48xf32>
    %7 = vector.extract_strided_slice %6 {offsets = [0, 32], sizes = [8, 16], strides = [1, 1]} : vector<8x48xf32> to vector<8x16xf32>
    %c0_8 = arith.constant 0 : index
    %c0_9 = arith.constant 0 : index
    %8 = vector.load %arg2[%c0_8, %c0_9] : memref<48x64xf32, #tpu.memory_space<vmem>>, vector<48x64xf32>
    %cst = arith.constant dense<0.000000e+00> : vector<8x64xf32>
    %9 = tpu.matmul %6, %8, %cst {dimension_numbers = #tpu.dot_dimension_numbers<[1], [0], [0], [1], [0, 0, 1, 1], [], []>} : vector<8x48xf32>, vector<48x64xf32>, vector<8x64xf32> -> vector<8x64xf32>
    %10 = vector.broadcast %0 : vector<1x64xf32> to vector<8x64xf32>
    %11 = arith.addf %9, %10 : vector<8x64xf32>
    %cst_10 = arith.constant 0.000000e+00 : f32
    %12 = vector.broadcast %cst_10 : f32 to vector<8x64xf32>
    %13 = arith.cmpf oge, %11, %12 : vector<8x64xf32>
    %cst_11 = arith.constant 0.00999999977 : f32
    %14 = vector.broadcast %cst_11 : f32 to vector<8x64xf32>
    %15 = arith.mulf %14, %11 : vector<8x64xf32>
    %16 = arith.select %13, %11, %15 : vector<8x64xi1>, vector<8x64xf32>
    %c0_12 = arith.constant 0 : index
    %c0_13 = arith.constant 0 : index
    %17 = vector.load %arg3[%c0_12, %c0_13] : memref<64x32xf32, #tpu.memory_space<vmem>>, vector<64x32xf32>
    %cst_14 = arith.constant dense<0.000000e+00> : vector<8x32xf32>
    %18 = tpu.matmul %16, %17, %cst_14 {dimension_numbers = #tpu.dot_dimension_numbers<[1], [0], [0], [1], [0, 0, 1, 1], [], []>} : vector<8x64xf32>, vector<64x32xf32>, vector<8x32xf32> -> vector<8x32xf32>
    %19 = vector.broadcast %1 : vector<1x32xf32> to vector<8x32xf32>
    %20 = arith.addf %18, %19 : vector<8x32xf32>
    %cst_15 = arith.constant 0.000000e+00 : f32
    %21 = vector.broadcast %cst_15 : f32 to vector<8x32xf32>
    %22 = arith.cmpf oge, %20, %21 : vector<8x32xf32>
    %cst_16 = arith.constant 0.00999999977 : f32
    %23 = vector.broadcast %cst_16 : f32 to vector<8x32xf32>
    %24 = arith.mulf %23, %20 : vector<8x32xf32>
    %25 = arith.select %22, %20, %24 : vector<8x32xi1>, vector<8x32xf32>
    %c0_17 = arith.constant 0 : index
    %c0_18 = arith.constant 0 : index
    %26 = vector.load %arg4[%c0_17, %c0_18] : memref<32x32xf32, #tpu.memory_space<vmem>>, vector<32x32xf32>
    %cst_19 = arith.constant dense<0.000000e+00> : vector<8x32xf32>
    %27 = tpu.matmul %25, %26, %cst_19 {dimension_numbers = #tpu.dot_dimension_numbers<[1], [0], [0], [1], [0, 0, 1, 1], [], []>} : vector<8x32xf32>, vector<32x32xf32>, vector<8x32xf32> -> vector<8x32xf32>
    %28 = vector.broadcast %2 : vector<1x32xf32> to vector<8x32xf32>
    %29 = arith.addf %27, %28 : vector<8x32xf32>
    %30 = vector.extract_strided_slice %29 {offsets = [0, 0], sizes = [8, 16], strides = [1, 1]} : vector<8x32xf32> to vector<8x16xf32>
    %31 = vector.extract_strided_slice %29 {offsets = [0, 16], sizes = [8, 16], strides = [1, 1]} : vector<8x32xf32> to vector<8x16xf32>
    %cst_20 = arith.constant 5.000000e-01 : f32
    %32 = vector.broadcast %cst_20 : f32 to vector<8x16xf32>
    %33 = arith.mulf %32, %31 : vector<8x16xf32>
    %34 = math.exp %33 : vector<8x16xf32>
    %35 = arith.mulf %7, %34 : vector<8x16xf32>
    %36 = arith.addf %30, %35 : vector<8x16xf32>
    %c0_21 = arith.constant 0 : index
    %c0_22 = arith.constant 0 : index
    %37 = vector.load %arg5[%c0_21, %c0_22] : memref<16x32xf32, #tpu.memory_space<vmem>>, vector<16x32xf32>
    %cst_23 = arith.constant dense<0.000000e+00> : vector<8x32xf32>
    %38 = tpu.matmul %36, %37, %cst_23 {dimension_numbers = #tpu.dot_dimension_numbers<[1], [0], [0], [1], [0, 0, 1, 1], [], []>} : vector<8x16xf32>, vector<16x32xf32>, vector<8x32xf32> -> vector<8x32xf32>
    %39 = vector.broadcast %3 : vector<1x32xf32> to vector<8x32xf32>
    %40 = arith.addf %38, %39 : vector<8x32xf32>
    %cst_24 = arith.constant 0.000000e+00 : f32
    %41 = vector.broadcast %cst_24 : f32 to vector<8x32xf32>
    %42 = arith.cmpf oge, %40, %41 : vector<8x32xf32>
    %cst_25 = arith.constant 0.00999999977 : f32
    %43 = vector.broadcast %cst_25 : f32 to vector<8x32xf32>
    %44 = arith.mulf %43, %40 : vector<8x32xf32>
    %45 = arith.select %42, %40, %44 : vector<8x32xi1>, vector<8x32xf32>
    %c0_26 = arith.constant 0 : index
    %c0_27 = arith.constant 0 : index
    %46 = vector.load %arg6[%c0_26, %c0_27] : memref<32x64xf32, #tpu.memory_space<vmem>>, vector<32x64xf32>
    %cst_28 = arith.constant dense<0.000000e+00> : vector<8x64xf32>
    %47 = tpu.matmul %45, %46, %cst_28 {dimension_numbers = #tpu.dot_dimension_numbers<[1], [0], [0], [1], [0, 0, 1, 1], [], []>} : vector<8x32xf32>, vector<32x64xf32>, vector<8x64xf32> -> vector<8x64xf32>
    %48 = vector.broadcast %4 : vector<1x64xf32> to vector<8x64xf32>
    %49 = arith.addf %47, %48 : vector<8x64xf32>
    %cst_29 = arith.constant 0.000000e+00 : f32
    %50 = vector.broadcast %cst_29 : f32 to vector<8x64xf32>
    %51 = arith.cmpf oge, %49, %50 : vector<8x64xf32>
    %cst_30 = arith.constant 0.00999999977 : f32
    %52 = vector.broadcast %cst_30 : f32 to vector<8x64xf32>
    %53 = arith.mulf %52, %49 : vector<8x64xf32>
    %54 = arith.select %51, %49, %53 : vector<8x64xi1>, vector<8x64xf32>
    %c0_31 = arith.constant 0 : index
    %c0_32 = arith.constant 0 : index
    %55 = vector.load %arg7[%c0_31, %c0_32] : memref<64x32xf32, #tpu.memory_space<vmem>>, vector<64x32xf32>
    %cst_33 = arith.constant dense<0.000000e+00> : vector<8x32xf32>
    %56 = tpu.matmul %54, %55, %cst_33 {dimension_numbers = #tpu.dot_dimension_numbers<[1], [0], [0], [1], [0, 0, 1, 1], [], []>} : vector<8x64xf32>, vector<64x32xf32>, vector<8x32xf32> -> vector<8x32xf32>
    %57 = vector.broadcast %5 : vector<1x32xf32> to vector<8x32xf32>
    %58 = arith.addf %56, %57 : vector<8x32xf32>
    %59 = math.tanh %58 : vector<8x32xf32>
    %c0_34 = arith.constant 0 : index
    %c0_35 = arith.constant 0 : index
    %60 = vector.load %arg9[%c0_34, %c0_35] : memref<8x64xf32, #tpu.memory_space<vmem>>, vector<8x32xf32>
    tpu.vector_store %arg9[%c0_34, %c0_35], %59 {strides = array<i32>} : memref<8x64xf32, #tpu.memory_space<vmem>>, vector<8x32xf32>,
    %c0_36 = arith.constant 0 : index
    %c32 = arith.constant 32 : index
    %61 = vector.load %arg9[%c0_36, %c32] : memref<8x64xf32, #tpu.memory_space<vmem>>, vector<8x32xf32>
    tpu.vector_store %arg9[%c0_36, %c32], %29 {strides = array<i32>} : memref<8x64xf32, #tpu.memory_space<vmem>>, vector<8x32xf32>,
    return
  }
  func.func @transform_0(%arg0: i32) -> (i32, i32) {
    %c0_i32 = arith.constant 0 : i32
    %c0_i32_0 = arith.constant 0 : i32
    return %arg0, %c0_i32 : i32, i32
  }
  func.func @transform_1(%arg0: i32) -> (i32, i32) {
    %c0_i32 = arith.constant 0 : i32
    %c0_i32_0 = arith.constant 0 : i32
    %c0_i32_1 = arith.constant 0 : i32
    return %c0_i32, %c0_i32_0 : i32, i32
  }
  func.func @transform_2(%arg0: i32) -> (i32, i32) {
    %c0_i32 = arith.constant 0 : i32
    %c0_i32_0 = arith.constant 0 : i32
    %c0_i32_1 = arith.constant 0 : i32
    return %c0_i32, %c0_i32_0 : i32, i32
  }
  func.func @transform_3(%arg0: i32) -> (i32, i32) {
    %c0_i32 = arith.constant 0 : i32
    %c0_i32_0 = arith.constant 0 : i32
    %c0_i32_1 = arith.constant 0 : i32
    return %c0_i32, %c0_i32_0 : i32, i32
  }
  func.func @transform_4(%arg0: i32) -> (i32, i32) {
    %c0_i32 = arith.constant 0 : i32
    %c0_i32_0 = arith.constant 0 : i32
    %c0_i32_1 = arith.constant 0 : i32
    return %c0_i32, %c0_i32_0 : i32, i32
  }
  func.func @transform_5(%arg0: i32) -> (i32, i32) {
    %c0_i32 = arith.constant 0 : i32
    %c0_i32_0 = arith.constant 0 : i32
    %c0_i32_1 = arith.constant 0 : i32
    return %c0_i32, %c0_i32_0 : i32, i32
  }
  func.func @transform_6(%arg0: i32) -> (i32, i32) {
    %c0_i32 = arith.constant 0 : i32
    %c0_i32_0 = arith.constant 0 : i32
    %c0_i32_1 = arith.constant 0 : i32
    return %c0_i32, %c0_i32_0 : i32, i32
  }
  func.func @transform_7(%arg0: i32) -> (i32, i32) {
    %c0_i32 = arith.constant 0 : i32
    %c0_i32_0 = arith.constant 0 : i32
    %c0_i32_1 = arith.constant 0 : i32
    return %c0_i32, %c0_i32_0 : i32, i32
  }
  func.func @transform_8(%arg0: i32) -> (i32, i32) {
    %c0_i32 = arith.constant 0 : i32
    %c0_i32_0 = arith.constant 0 : i32
    return %arg0, %c0_i32 : i32, i32
  }
}

</mosaic_0001>

<bundles_post_ra>
// kernel: tpu_custom_call.1
= control target key start
LH: loop header
LB: loop body
LE: loop exit
PB: predicated region body
PF: predicated region fallthrough
CT: control target
= control target key end

     0   :  { %s486_s0 = inlined_call_operand.vmem [shape: f32[8,48], index: 0, kind: input, shape index: {}]   ;;  %s487_s1 = inlined_call_operand.vmem [shape: f32[48,64], index: 1, kind: input, shape index: {}]   ;;  %s488_s2 = inlined_call_operand.vmem [shape: f32[64,32], index: 2, kind: input, shape index: {}]   ;;  %s489_s3 = inlined_call_operand.vmem [shape: f32[32,32], index: 3, kind: input, shape index: {}]   ;;  %s490_s4 = inlined_call_operand.vmem [shape: f32[16,32], index: 4, kind: input, shape index: {}]   ;;  %s491_s5 = inlined_call_operand.vmem [shape: f32[32,64], index: 5, kind: input, shape index: {}]   ;;  %s492_s6 = inlined_call_operand.vmem [shape: f32[64,32], index: 6, kind: input, shape index: {}]   ;;  %s493_s7 = inlined_call_operand.vmem [shape: f32[8,128], index: 7, kind: input, shape index: {}]   ;;  %s494_s8 = inlined_call_operand.hbm [shape: f32[8,64], index: 8, kind: output, shape index: {}]  }
   0x1   :  { %v42_v0 = vld [vmem:[%s487_s1 + $0x28] sm:$0xff]  ;;  %v41_v1 = vld [vmem:[%s487_s1 + $0x20] sm:$0xff]  ;;  %v40_v2 = vld [vmem:[%s487_s1 + $0x18] sm:$0xff] }
   0x2   :  { %58 = vmatpush.msra.mxu0 %v42_v0  ;;  %v78_v3 = vld [vmem:[%s488_s2 + $0x38] sm:$0xff]  ;;  %v77_v4 = vld [vmem:[%s488_s2 + $0x30] sm:$0xff]  ;;  %v38_v6 = vld [vmem:[%s487_s1 + $0x8] sm:$0xff] }
   0x3   :  { %v39_v5 = vld [vmem:[%s487_s1 + $0x10] sm:$0xff]  ;;  %92 = vmatpush.msra.mxu1 %v78_v3  ;;  %v76_v7 = vld [vmem:[%s488_s2 + $0x28] sm:$0xff]  ;;  %v75_v8 = vld [vmem:[%s488_s2 + $0x20] sm:$0xff] }
   0x4   :  { %59 = vmatpush.msra.mxu0 %v41_v1 }
   0x5   :  { %93 = vmatpush.msra.mxu1 %v77_v4 }
   0x6   :  { %60 = vmatpush.msra.mxu0 %v40_v2 }
   0x7   :  { %13 = vsyncpa [#allocation3], 0  ;;  %94 = vmatpush.msra.mxu1 %v76_v7  ;;  %v37_v9 = vld [vmem:[%s487_s1] sm:$0xff]  ;;  %v74_v10 = vld [vmem:[%s488_s2 + $0x18] sm:$0xff]  ;;  %vm44_vm0 = vcmask 392192   ;;  %vm80_vm2 = vcmask 523264  }
   0x8   :  { %61 = vmatpush.msra.mxu0 %v39_v5  ;;  %v36_v11 = vld [vmem:[%s486_s0] sm:$0xff]  ;;  %v73_v12 = vld [vmem:[%s488_s2 + $0x10] sm:$0xff]  ;;  %v72_v13 = vld [vmem:[%s488_s2 + $0x8] sm:$0xff]  ;;  %vm112_vm4 = vcmask 261120   ;;  %s313_s24 = smov 16   ;;  %s314_s27 = smov 96  }
   0x9   :  { %95 = vmatpush.msra.mxu1 %v75_v8  ;;  %v71_v14 = vld [vmem:[%s488_s2] sm:$0xff]  ;;  %v110_v15 = vld [vmem:[%s489_s3 + $0x18] sm:$0xff]  ;;  %v109_v21 = vld [vmem:[%s489_s3 + $0x10] sm:$0xff]  ;;  %vm152_vm5 = vcmask 130048   ;;  %s257_s0 = sshll.u32 %s494_s8, 4  ;;  %vm248_vm8 = vcmask 523520   ;;  %s258_s0 = int_to_ptr.hbm [resolvable:$true] %s257_s0 }
   0xa   :  { %62 = vmatpush.msra.mxu0 %v38_v6  ;;  %v276_v16 = vld [vmem:[%s493_s7] ss:$0 sm:$0xff]  ;;  %v108_v22 = vld [vmem:[%s489_s3 + $0x8] sm:$0xff]  ;;  %v277_v24 = vld [vmem:[%s493_s7 + $0x1] ss:$0 sm:$0xff] }
   0xb   :  { %96 = vmatpush.msra.mxu1 %v74_v10  ;;  %v107_v23 = vld [vmem:[%s489_s3] sm:$0xff]  ;;  %s312_s3 = smov 32   ;;  %v150_v35 = vld [vmem:[%s490_s4 + $0x8] sm:$0xff]  ;;  %v182_v39 = vld [vmem:[%s491_s5 + $0x18] sm:$0xff] }
   0xc   :  { %63 = vmatpush.msra.mxu0 %v37_v9  ;;  %v278_v29 = vld [vmem:[%s493_s7 + $0x2] ss:$0 sm:$0xff]  ;;  %170 = vmatpush.msra.mxu3 %v150_v35  ;;  %v181_v42 = vld [vmem:[%s491_s5 + $0x10] sm:$0xff]  ;;  %v180_v43 = vld [vmem:[%s491_s5 + $0x8] sm:$0xff] }
   0xd   :  { %266 = vmatmul.msk.f32.vlgmr.msra.gmra.mxu0 %vm44_vm0, %v36_v11  ;;  %97 = vmatpush.msra.mxu1 %v73_v12  ;;  %v149_v38 = vld [vmem:[%s490_s4] sm:$0xff]  ;;  %v217_v45 = vld [vmem:[%s492_s6 + $0x38] sm:$0xff]  ;;  %v216_v46 = vld [vmem:[%s492_s6 + $0x30] sm:$0xff] }
   0xe   :  { %128 = vmatpush.msrb.mxu0 %v110_v15  ;;  %171 = vmatpush.msra.mxu3 %v149_v38  ;;  %v179_v44 = vld [vmem:[%s491_s5] sm:$0xff]  ;;  %v215_v47 = vld [vmem:[%s492_s6 + $0x28] sm:$0xff]  ;;  %v213_v49 = vld [vmem:[%s492_s6 + $0x18] sm:$0xff] }
   0xf   :  { %98 = vmatpush.msra.mxu1 %v72_v13  ;;  %230 = vmatpush.msra.mxu2 %v217_v45  ;;  %v214_v48 = vld [vmem:[%s492_s6 + $0x20] sm:$0xff]  ;;  %v212_v55 = vld [vmem:[%s492_s6 + $0x10] sm:$0xff]  ;;  %v211_v56 = vld [vmem:[%s492_s6 + $0x8] sm:$0xff] }
  0x10   :  { %129 = vmatpush.msrb.mxu0 %v109_v21  ;;  %199 = vmatpush.msrb.mxu3 %v182_v39  ;;  %v279_v50 = vld [vmem:[%s493_s7 + $0x3] ss:$0 sm:$0xff]  ;;  %v280_v58 = vld [vmem:[%s493_s7 + $0x4] ss:$0 sm:$0xff]  ;;  %v281_v63 = vld [vmem:[%s493_s7 + $0x5] ss:$0 sm:$0xff] }
  0x11   :  { %99 = vmatpush.msra.mxu1 %v71_v14  ;;  %231 = vmatpush.msra.mxu2 %v216_v46  ;;  %v210_v57 = vld [vmem:[%s492_s6] sm:$0xff]  ;;  %s315_s6 = smov [#allocation2]  }
  0x12   :  { %130 = vmatpush.msrb.mxu0 %v108_v22  ;;  %200 = vmatpush.msrb.mxu3 %v181_v42  ;;  %s255_s9 = sshll.u32 %s315_s6, 4  ;;  %s256_s9 = int_to_ptr.vmem [resolvable:$true] %s255_s9 }
  0x13   :  { %232 = vmatpush.msra.mxu2 %v215_v47 }
  0x14   :  { %131 = vmatpush.msrb.mxu0 %v107_v23  ;;  %201 = vmatpush.msrb.mxu3 %v180_v43 }
  0x15   :  { %233 = vmatpush.msra.mxu2 %v214_v48 }
  0x16   :  { %202 = vmatpush.msrb.mxu3 %v179_v44 }
  0x17   :  { %234 = vmatpush.msra.mxu2 %v213_v49 }
  0x19   :  { %235 = vmatpush.msra.mxu2 %v212_v55 }
  0x1b   :  { %236 = vmatpush.msra.mxu2 %v211_v56 }
  0x1d   :  { %237 = vmatpush.msra.mxu2 %v210_v57 }
  0x8a   :  { %v65_v17 = vpop.f32.mrf.mxu0 }
  0x8b   :  { %v66_v18 = vadd.f32 %v276_v16, %v65_v17 }
  0x8d   :  { %v69_v19 = vmul.f32 0.01, %v66_v18  ;;  %vm68_vm1 = vcmp.ge.f32.partialorder %v66_v18, 0.0 }
  0x8f   :  { %v70_v20 = vsel %vm68_vm1, %v66_v18, %v69_v19 }
  0x90   :  { %267 = vmatmul.msk.f32.vlgmr.msra.gmra.mxu1 %vm80_vm2, %v70_v20 }
 0x10d   :  { %v101_v25 = vpop.f32.mrf.mxu1 }
 0x10e   :  { %v102_v26 = vadd.f32 %v277_v24, %v101_v25 }
 0x110   :  { %vm104_vm3 = vcmp.ge.f32.partialorder %v102_v26, 0.0  ;;  %v105_v27 = vmul.f32 0.01, %v102_v26 }
 0x112   :  { %v106_v28 = vsel %vm104_vm3, %v102_v26, %v105_v27 }
 0x113   :  { %268 = vmatmul.msk.f32.vlgmr.msrb.gmra.mxu0 %vm112_vm4, %v106_v28 }
 0x190   :  { %v133_v30 = vpop.f32.mrf.mxu0 }
 0x191   :  { %v134_v31 = vadd.f32 %v278_v29, %v133_v30 }
 0x193   :  { %v136_v32 = vmul.f32 0.5, %v134_v31  ;;  %245 = vrot.lane.b32.xlu1 %v134_v31, %s312_s3 }
 0x195   :  { %v137_v33 = vmul.f32 1.442695, %v136_v32 }
 0x197   :  { %282 = vpow2.f32 %v137_v33 }
 0x19d   :  { %v283_v34 = vpop.eup %282 }
 0x19e   :  { %140 = vrot.lane.b32.xlu0 %v283_v34, %s313_s24 }
 0x205   :  { %v246_v3 = vpop.permute.xlu1 %245 }
 0x210   :  { %v141_v36 = vpop.permute.xlu0 %140 }
 0x211   :  { %v143_v37 = vmul.f32 %v141_v36, %v36_v11 }
 0x213   :  { %145 = vrot.lane.b32.xlu0 %v143_v37, %s314_s27 }
 0x285   :  { %v146_v40 = vpop.permute.xlu0 %145 }
 0x286   :  { %v148_v41 = vadd.f32 %v146_v40, %v134_v31 }
 0x288   :  { %269 = vmatmul.msk.f32.vlgmr.msra.gmra.mxu3 %vm152_vm5, %v148_v41 }
 0x30b   :  { %v173_v51 = vpop.f32.mrf.mxu3 }
 0x30c   :  { %v174_v52 = vadd.f32 %v279_v50, %v173_v51 }
 0x30e   :  { %vm176_vm6 = vcmp.ge.f32.partialorder %v174_v52, 0.0  ;;  %v177_v53 = vmul.f32 0.01, %v174_v52 }
 0x310   :  { %v178_v54 = vsel %vm176_vm6, %v174_v52, %v177_v53 }
 0x311   :  { %270 = vmatmul.msk.f32.vlgmr.msrb.gmra.mxu3 %vm112_vm4, %v178_v54 }
 0x394   :  { %v204_v59 = vpop.f32.mrf.mxu3 }
 0x395   :  { %v205_v60 = vadd.f32 %v280_v58, %v204_v59 }
 0x397   :  { %v208_v61 = vmul.f32 0.01, %v205_v60  ;;  %vm207_vm7 = vcmp.ge.f32.partialorder %v205_v60, 0.0 }
 0x399   :  { %v209_v62 = vsel %vm207_vm7, %v205_v60, %v208_v61 }
 0x39a   :  { %271 = vmatmul.msk.f32.vlgmr.msra.gmra.mxu2 %vm80_vm2, %v209_v62 }
 0x41d   :  { %v239_v0 = vpop.f32.mrf.mxu2 }
 0x41e   :  { %v240_v1 = vadd.f32 %v281_v63, %v239_v0 }
 0x420   :  { %284 = vtanh.f32 %v240_v1 }
 0x426   :  { %v285_v2 = vpop.eup %284 }
 0x427   :  { %243 = vst.msk [vmem:[#allocation2] sm:$0xff] %vm112_vm4, %v285_v2 }
 0x428   :  { %249 = vst.msk [vmem:[#allocation2] sm:$0xff] %vm248_vm8, %v246_v3 }
 0x429   :  { %260 = dma.vmem_to_hbm [thread:$0]  %s256_s9, 128, %s258_s0, [#allocation3]  }
 0x42a   :  { %310 = dma.done.wait [#allocation3], 128  }
 0x42b   :  { %311 = vsyncadd [#allocation3], 4294967168 }
 0x42c   :  { %265 = vsyncpa [#allocation3], 1 }

</bundles_post_ra>
